<compile_context>
chip_gen: v6e
topology: v6e:2x2x1
jax: 0.10.0
libtpu: 0.0.40
codegen_flags: <defaults>
</compile_context>

<pallas_src>
import functools

import jax
import jax.numpy as jnp
from jax.experimental import pallas as pl
from jax.experimental.pallas import tpu as pltpu

# ----------------------------- dimensions ----------------------------------
BATCH    = 64
D_LOCAL  = 32
D_GLOBAL = 32
HIDDEN   = 32
D_OUT    = 16

D_CAT = D_LOCAL + D_GLOBAL   # 64  (concatenated input features)
H2    = 2 * HIDDEN           # 64  (concatenated hidden features)


# ------------------------------ kernel --------------------------------------
def two_stream_kernel(xl_ref, xg_ref, w12_ref, b12_ref, wf_ref, bf_ref, o_ref):
    cdt = w12_ref.dtype  # bf16 compute dtype (MXU-native), f32 accumulation

    # Fused encoders: z = relu([xl | xg] @ block_diag(W1, W2) + [b1 | b2]),
    # with the concat folded away by splitting W12 along sublanes.
    xl = xl_ref[...].astype(cdt)
    xg = xg_ref[...].astype(cdt)
    z = jnp.dot(xl, w12_ref[:D_LOCAL, :], preferred_element_type=jnp.float32)
    z += jnp.dot(xg, w12_ref[D_LOCAL:, :], preferred_element_type=jnp.float32)
    z = jnp.maximum(z + b12_ref[...], 0.0)

    # Fusion head on the concatenated hidden state.
    out = jnp.dot(z.astype(cdt), wf_ref[...],
                  preferred_element_type=jnp.float32) + bf_ref[...]
    o_ref[...] = out.astype(o_ref.dtype)


# --------------------------- one-time packing -------------------------------
def pack_params(params, *, compute_dtype=jnp.bfloat16):
    """Build the block-diagonal encoder weight & concatenated biases ONCE."""
    w1, b1, w2, b2, wf, bf = params
    w12 = jnp.zeros((D_CAT, H2), jnp.float32)
    w12 = w12.at[:D_LOCAL, :HIDDEN].set(w1)
    w12 = w12.at[D_LOCAL:, HIDDEN:].set(w2)
    w12 = w12.astype(compute_dtype)                       # (64, 64) bf16
    b12 = jnp.concatenate([b1, b2], axis=-1)              # (1, 64)  f32
    wf_c = wf.astype(compute_dtype)                       # (64, 16) bf16
    bf_c = bf                                             # (1, 16)  f32
    return (jax.device_put(w12), jax.device_put(b12),
            jax.device_put(wf_c), jax.device_put(bf_c))


# ------------------------------ wrapper --------------------------------------
def _pick_batch_tile(B):
    # Whole batch in one grid step while it fits comfortably in VMEM; the
    # per-step overhead dominates at this problem size on all generations.
    return B if B <= 256 else 256


@functools.partial(jax.jit, static_argnames=())
def two_stream_forward(x_local, x_global, packed):
    w12, b12, wf, bf = packed
    B = x_local.shape[0]
    TB = _pick_batch_tile(B)
    assert B % TB == 0

    resident = lambda shape: pl.BlockSpec(shape, lambda i: (0, 0))

    return pl.pallas_call(
        two_stream_kernel,
        out_shape=jax.ShapeDtypeStruct((B, D_OUT), jnp.float32),
        grid=(B // TB,),
        in_specs=[
            pl.BlockSpec((TB, D_LOCAL),  lambda i: (i, 0)),   # x_local (streamed)
            pl.BlockSpec((TB, D_GLOBAL), lambda i: (i, 0)),   # x_global (streamed)
            resident((D_CAT, H2)),                            # W12 (block diag)
            resident((1, H2)),                                # b12
            resident((H2, D_OUT)),                            # Wf
            resident((1, D_OUT)),                             # bf
        ],
        out_specs=pl.BlockSpec((TB, D_OUT), lambda i: (i, 0)),
        compiler_params=pltpu.CompilerParams(
            dimension_semantics=("parallel",)),
    )(x_local, x_global, w12, b12, wf, bf)


# ------------------------------ reference ------------------------------------
def init_params(key):
    k1, k2, k3, k4, k5, k6 = jax.random.split(key, 6)
    w1 = jax.random.normal(k1, (D_LOCAL, HIDDEN), jnp.float32) * 0.05
    b1 = jax.random.normal(k2, (1, HIDDEN), jnp.float32) * 0.01
    w2 = jax.random.normal(k3, (D_GLOBAL, HIDDEN), jnp.float32) * 0.05
    b2 = jax.random.normal(k4, (1, HIDDEN), jnp.float32) * 0.01
    wf = jax.random.normal(k5, (2 * HIDDEN, D_OUT), jnp.float32) * 0.05
    bf = jax.random.normal(k6, (1, D_OUT), jnp.float32) * 0.01
    return (w1, b1, w2, b2, wf, bf)


def reference_forward(x_local, x_global, params, *, compute_dtype=jnp.bfloat16):
    # Same math as the PyTorch module, with inputs/weights/hidden state
    # quantized to the kernel's compute dtype (then upcast) so the comparison
    # isolates kernel structure rather than the bf16 cast itself.
    w1, b1, w2, b2, wf, bf = params
    q = lambda a: a.astype(compute_dtype).astype(jnp.float32)
    z1 = jax.nn.relu(q(x_local) @ q(w1) + b1)
    z2 = jax.nn.relu(q(x_global) @ q(w2) + b2)
    z = jnp.concatenate([z1, z2], axis=-1)
    return q(z) @ q(wf) + bf


if __name__ == "__main__":
    key = jax.random.PRNGKey(0)
    kx, kg, kp = jax.random.split(key, 3)
    x_local  = jax.random.normal(kx, (BATCH, D_LOCAL),  jnp.float32)
    x_global = jax.random.normal(kg, (BATCH, D_GLOBAL), jnp.float32)
    params = init_params(kp)
    packed = pack_params(params)          # one-time, cached outside the forward

    out = two_stream_forward(x_local, x_global, packed)
    out = jax.block_until_ready(out)

    ref = reference_forward(x_local, x_global, params)
    assert out.shape == (BATCH, D_OUT)
    assert jnp.allclose(out, ref, atol=1e-2, rtol=1e-2)
    print("KERNEL_OK")
</pallas_src>

<mosaic_0001>
module attributes {stable_mosaic.version = 11 : i64} {
  func.func @two_stream_kernel(%arg0: i32, %arg1: memref<64x32xf32, #tpu.memory_space<vmem>>, %arg2: memref<64x32xf32, #tpu.memory_space<vmem>>, %arg3: memref<64x64xbf16, #tpu.memory_space<vmem>>, %arg4: memref<1x64xf32, #tpu.memory_space<vmem>>, %arg5: memref<64x16xbf16, #tpu.memory_space<vmem>>, %arg6: memref<1x16xf32, #tpu.memory_space<vmem>>, %arg7: memref<64x16xf32, #tpu.memory_space<vmem>>) attributes {dimension_semantics = [#tpu.dimension_semantics<parallel>], iteration_bounds = array<i64: 1>, scalar_prefetch = 0 : i64, scratch_operands = 0 : i64, tpu.core_type = #tpu.core_type<tc>, window_params = [{transform_indices = @transform_0, window_bounds = array<i64: 64, 32>}, {transform_indices = @transform_1, window_bounds = array<i64: 64, 32>}, {pipeline_mode = #tpu.pipeline_mode<synchronous>, transform_indices = @transform_2, window_bounds = array<i64: 64, 64>}, {pipeline_mode = #tpu.pipeline_mode<synchronous>, transform_indices = @transform_3, window_bounds = array<i64: 1, 64>}, {pipeline_mode = #tpu.pipeline_mode<synchronous>, transform_indices = @transform_4, window_bounds = array<i64: 64, 16>}, {pipeline_mode = #tpu.pipeline_mode<synchronous>, transform_indices = @transform_5, window_bounds = array<i64: 1, 16>}, {transform_indices = @transform_6, window_bounds = array<i64: 64, 16>}]} {
    %c0 = arith.constant 0 : index
    %c0_0 = arith.constant 0 : index
    %0 = vector.load %arg1[%c0, %c0_0] : memref<64x32xf32, #tpu.memory_space<vmem>>, vector<64x32xf32>
    %1 = arith.truncf %0 : vector<64x32xf32> to vector<64x32xbf16>
    %c0_1 = arith.constant 0 : index
    %c0_2 = arith.constant 0 : index
    %2 = vector.load %arg2[%c0_1, %c0_2] : memref<64x32xf32, #tpu.memory_space<vmem>>, vector<64x32xf32>
    %3 = arith.truncf %2 : vector<64x32xf32> to vector<64x32xbf16>
    %c0_3 = arith.constant 0 : index
    %c0_4 = arith.constant 0 : index
    %4 = vector.load %arg3[%c0_3, %c0_4] : memref<64x64xbf16, #tpu.memory_space<vmem>>, vector<32x64xbf16>
    %cst = arith.constant dense<0.000000e+00> : vector<64x64xf32>
    %5 = tpu.matmul %1, %4, %cst {dimension_numbers = #tpu.dot_dimension_numbers<[1], [0], [0], [1], [0, 0, 1, 1], [], []>} : vector<64x32xbf16>, vector<32x64xbf16>, vector<64x64xf32> -> vector<64x64xf32>
    %c32 = arith.constant 32 : index
    %c0_5 = arith.constant 0 : index
    %6 = vector.load %arg3[%c32, %c0_5] : memref<64x64xbf16, #tpu.memory_space<vmem>>, vector<32x64xbf16>
    %cst_6 = arith.constant dense<0.000000e+00> : vector<64x64xf32>
    %7 = tpu.matmul %3, %6, %cst_6 {dimension_numbers = #tpu.dot_dimension_numbers<[1], [0], [0], [1], [0, 0, 1, 1], [], []>} : vector<64x32xbf16>, vector<32x64xbf16>, vector<64x64xf32> -> vector<64x64xf32>
    %8 = arith.addf %5, %7 : vector<64x64xf32>
    %c0_7 = arith.constant 0 : index
    %c0_8 = arith.constant 0 : index
    %9 = vector.load %arg4[%c0_7, %c0_8] : memref<1x64xf32, #tpu.memory_space<vmem>>, vector<1x64xf32>
    %10 = vector.broadcast %9 : vector<1x64xf32> to vector<64x64xf32>
    %11 = arith.addf %8, %10 : vector<64x64xf32>
    %cst_9 = arith.constant 0.000000e+00 : f32
    %12 = vector.broadcast %cst_9 : f32 to vector<64x64xf32>
    %13 = arith.maximumf %11, %12 : vector<64x64xf32>
    %14 = arith.truncf %13 : vector<64x64xf32> to vector<64x64xbf16>
    %c0_10 = arith.constant 0 : index
    %c0_11 = arith.constant 0 : index
    %15 = vector.load %arg5[%c0_10, %c0_11] : memref<64x16xbf16, #tpu.memory_space<vmem>>, vector<64x16xbf16>
    %cst_12 = arith.constant dense<0.000000e+00> : vector<64x16xf32>
    %16 = tpu.matmul %14, %15, %cst_12 {dimension_numbers = #tpu.dot_dimension_numbers<[1], [0], [0], [1], [0, 0, 1, 1], [], []>} : vector<64x64xbf16>, vector<64x16xbf16>, vector<64x16xf32> -> vector<64x16xf32>
    %c0_13 = arith.constant 0 : index
    %c0_14 = arith.constant 0 : index
    %17 = vector.load %arg6[%c0_13, %c0_14] : memref<1x16xf32, #tpu.memory_space<vmem>>, vector<1x16xf32>
    %18 = vector.broadcast %17 : vector<1x16xf32> to vector<64x16xf32>
    %19 = arith.addf %16, %18 : vector<64x16xf32>
    %c0_15 = arith.constant 0 : index
    %c0_16 = arith.constant 0 : index
    %20 = vector.load %arg7[%c0_15, %c0_16] : memref<64x16xf32, #tpu.memory_space<vmem>>, vector<64x16xf32>
    tpu.vector_store %arg7[%c0_15, %c0_16], %19 {strides = array<i32>} : memref<64x16xf32, #tpu.memory_space<vmem>>, vector<64x16xf32>,
    return
  }
  func.func @transform_0(%arg0: i32) -> (i32, i32) {
    %c0_i32 = arith.constant 0 : i32
    %c0_i32_0 = arith.constant 0 : i32
    return %arg0, %c0_i32 : i32, i32
  }
  func.func @transform_1(%arg0: i32) -> (i32, i32) {
    %c0_i32 = arith.constant 0 : i32
    %c0_i32_0 = arith.constant 0 : i32
    return %arg0, %c0_i32 : i32, i32
  }
  func.func @transform_2(%arg0: i32) -> (i32, i32) {
    %c0_i32 = arith.constant 0 : i32
    %c0_i32_0 = arith.constant 0 : i32
    %c0_i32_1 = arith.constant 0 : i32
    return %c0_i32, %c0_i32_0 : i32, i32
  }
  func.func @transform_3(%arg0: i32) -> (i32, i32) {
    %c0_i32 = arith.constant 0 : i32
    %c0_i32_0 = arith.constant 0 : i32
    %c0_i32_1 = arith.constant 0 : i32
    return %c0_i32, %c0_i32_0 : i32, i32
  }
  func.func @transform_4(%arg0: i32) -> (i32, i32) {
    %c0_i32 = arith.constant 0 : i32
    %c0_i32_0 = arith.constant 0 : i32
    %c0_i32_1 = arith.constant 0 : i32
    return %c0_i32, %c0_i32_0 : i32, i32
  }
  func.func @transform_5(%arg0: i32) -> (i32, i32) {
    %c0_i32 = arith.constant 0 : i32
    %c0_i32_0 = arith.constant 0 : i32
    %c0_i32_1 = arith.constant 0 : i32
    return %c0_i32, %c0_i32_0 : i32, i32
  }
  func.func @transform_6(%arg0: i32) -> (i32, i32) {
    %c0_i32 = arith.constant 0 : i32
    %c0_i32_0 = arith.constant 0 : i32
    return %arg0, %c0_i32 : i32, i32
  }
}

</mosaic_0001>

<bundles_post_ra>
// kernel: two_stream_forward.1
= control target key start
LH: loop header
LB: loop body
LE: loop exit
PB: predicated region body
PF: predicated region fallthrough
CT: control target
= control target key end

     0   :  { %vm68_vm0 = vcmask 261120   ;;  %vm301_vm1 = vcmask 523264   ;;  %vm379_vm2 = vcmask 130048   ;;  %s647_s2 = inlined_call_operand.vmem [shape: bf16[64,64], index: 2, kind: input, shape index: {}]   ;;  %s648_s1 = inlined_call_operand.vmem [shape: f32[64,32], index: 1, kind: input, shape index: {}]   ;;  %s649_s0 = inlined_call_operand.vmem [shape: f32[64,32], index: 0, kind: input, shape index: {}]   ;;  %s650_s4 = inlined_call_operand.vmem [shape: bf16[64,16], index: 4, kind: input, shape index: {}]   ;;  %s651_s3 = inlined_call_operand.vmem [shape: f32[1,64], index: 3, kind: input, shape index: {}]   ;;  %s652_s5 = inlined_call_operand.vmem [shape: f32[1,16], index: 5, kind: input, shape index: {}]   ;;  %s653_s6 = inlined_call_operand.vmem [shape: f32[64,16], index: 6, kind: output, shape index: {}]  }
   0x1   :  { %v482_v0 = vld [vmem:[%s647_s2 + $0x18] sm:$0xff]   ;;  %v483_v1 = vld [vmem:[%s647_s2 + $0x8] sm:$0xff]   ;;  %v484_v2 = vld [vmem:[%s647_s2 + $0x10] sm:$0xff]  }
   0x2   :  { %434 = vmatprep.subr.bf16.mxu0 %v482_v0  ;;  %446 = vmatprep.subr.bf16.mxu1 %v483_v1  ;;  %v485_v3 = vld [vmem:[%s647_s2] sm:$0xff]   ;;  %v37_v5 = vld [vmem:[%s648_s1 + $0x8] sm:$0xff]  ;;  %v38_v9 = vld [vmem:[%s648_s1 + $0x10] sm:$0xff] }
   0x3   :  { %435 = vmatpush3.bf16.msra.mxu0 %v482_v0  ;;  %447 = vmatpush3.bf16.msra.mxu1 %v483_v1  ;;  %v36_v4 = vld [vmem:[%s648_s1] sm:$0xff]  ;;  %v25_v8 = vld [vmem:[%s649_s0 + $0x8] sm:$0xff]  ;;  %v39_v10 = vld [vmem:[%s648_s1 + $0x18] sm:$0xff] }
   0x4   :  { %436 = vmatprep.subr.bf16.mxu0 %v484_v2  ;;  %v24_v6 = vld [vmem:[%s649_s0] sm:$0xff]  ;;  %448 = vmatprep.subr.bf16.mxu1 %v485_v3  ;;  %v44_v7 = vpack.c.bf16 %v37_v5, %v36_v4  ;;  %v45_v12 = vpack.c.bf16 %v39_v10, %v38_v9  ;;  %v26_v13 = vld [vmem:[%s649_s0 + $0x10] sm:$0xff]  ;;  %v27_v14 = vld [vmem:[%s649_s0 + $0x18] sm:$0xff] }
   0x5   :  { %v32_v11 = vpack.c.bf16 %v25_v8, %v24_v6  ;;  %v40_v15 = vld [vmem:[%s648_s1 + $0x20] sm:$0xff]  ;;  %v33_v16 = vpack.c.bf16 %v27_v14, %v26_v13  ;;  %v41_v17 = vld [vmem:[%s648_s1 + $0x28] sm:$0xff]  ;;  %v42_v22 = vld [vmem:[%s648_s1 + $0x30] sm:$0xff] }
   0x6   :  { %438 = vmatprep.mubr.msk.bf16.mxu0 %vm68_vm0, %v44_v7  ;;  %v28_v18 = vld [vmem:[%s649_s0 + $0x20] sm:$0xff]  ;;  %v29_v19 = vld [vmem:[%s649_s0 + $0x28] sm:$0xff]  ;;  %v46_v20 = vpack.c.bf16 %v41_v17, %v40_v15  ;;  %v43_v23 = vld [vmem:[%s648_s1 + $0x38] sm:$0xff] }
   0x7   :  { %437 = vmatpush3.bf16.msra.mxu0 %v484_v2  ;;  %449 = vmatpush3.bf16.msra.mxu1 %v485_v3  ;;  %v34_v21 = vpack.c.bf16 %v29_v19, %v28_v18  ;;  %v30_v24 = vld [vmem:[%s649_s0 + $0x30] sm:$0xff]  ;;  %v31_v25 = vld [vmem:[%s649_s0 + $0x38] sm:$0xff]  ;;  %v47_v26 = vpack.c.bf16 %v43_v23, %v42_v22  ;;  %v488_v30 = vld [vmem:[%s650_s4 + $0x8] sm:$0xff]  }
   0x8   :  { %450 = vmatprep.mubr.msk.bf16.mxu1 %vm68_vm0, %v32_v11  ;;  %v35_v27 = vpack.c.bf16 %v31_v25, %v30_v24  ;;  %v486_v28 = vld [vmem:[%s650_s4 + $0x18] sm:$0xff]   ;;  %v487_v29 = vld [vmem:[%s650_s4 + $0x10] sm:$0xff]   ;;  %v489_v31 = vld [vmem:[%s650_s4] sm:$0xff]  }
   0x9   :  { %458 = vmatprep.subr.bf16.mxu0 %v486_v28  ;;  %474 = vmatprep.subr.bf16.mxu1 %v486_v28  ;;  %v404_v40 = vld [vmem:[%s651_s3] ss:$0 sm:$0xff] }
   0xa   :  { %439 = vmatmul.mubr.msk.bf16.vlgmr.msra.gmra.mxu0 %vm68_vm0, %v45_v12  ;;  %451 = vmatmul.mubr.msk.bf16.vlgmr.msra.gmra.mxu1 %vm68_vm0, %v33_v16  ;;  %v405_v13 = vld [vmem:[%s652_s5] ss:$0 sm:$0xff] }
   0xb   :  { %442 = vmatprep.mubr.msk.bf16.mxu0 %vm68_vm0, %v46_v20  ;;  %454 = vmatprep.mubr.msk.bf16.mxu1 %vm68_vm0, %v34_v21 }
   0xc   :  { %459 = vmatpush3.bf16.msra.mxu0 %v486_v28  ;;  %478 = vmatpush3.bf16.msra.mxu1 %v486_v28 }
   0xd   :  { %460 = vmatprep.subr.bf16.mxu0 %v487_v29  ;;  %475 = vmatprep.subr.bf16.mxu1 %v487_v29 }
  0x10   :  { %461 = vmatpush3.bf16.msra.mxu0 %v487_v29  ;;  %479 = vmatpush3.bf16.msra.mxu1 %v487_v29 }
  0x11   :  { %462 = vmatprep.subr.bf16.mxu0 %v488_v30  ;;  %476 = vmatprep.subr.bf16.mxu1 %v488_v30 }
  0x12   :  { %443 = vmatmul.mubr.msk.bf16.gmra.mxu0 %vm68_vm0, %v47_v26  ;;  %455 = vmatmul.mubr.msk.bf16.gmra.mxu1 %vm68_vm0, %v35_v27 }
  0x14   :  { %463 = vmatpush3.bf16.msra.mxu0 %v488_v30  ;;  %480 = vmatpush3.bf16.msra.mxu1 %v488_v30 }
  0x15   :  { %464 = vmatprep.subr.bf16.mxu0 %v489_v31  ;;  %477 = vmatprep.subr.bf16.mxu1 %v489_v31 }
  0x18   :  { %465 = vmatpush3.bf16.msra.mxu0 %v489_v31  ;;  %481 = vmatpush3.bf16.msra.mxu1 %v489_v31 }
  0xca   :  { %v440_v32 = vpop.f32.mrf.mxu0  ;;  %v452_v33 = vpop.f32.mrf.mxu1 }
  0xcb   :  { %v213_v38 = vadd.f32 %v452_v33, %v440_v32 }
  0xcc   :  { %v115_v34 = vpop.f32.mrf.mxu0  ;;  %v204_v35 = vpop.f32.mrf.mxu1 }
  0xcd   :  { %v205_v36 = vadd.f32 %v204_v35, %v115_v34  ;;  %v244_v48 = vadd.f32 %v404_v40, %v213_v38 }
  0xce   :  { %v441_v37 = vpop.f32.mrf.mxu0  ;;  %v453_v39 = vpop.f32.mrf.mxu1 }
  0xcf   :  { %v216_v41 = vadd.f32 %v453_v39, %v441_v37  ;;  %v242_v44 = vadd.f32 %v404_v40, %v205_v36  ;;  %v252_v58 = vmax.f32 %v244_v48, 0.0 }
  0xd0   :  { %v118_v42 = vpop.f32.mrf.mxu0  ;;  %v207_v43 = vpop.f32.mrf.mxu1 }
  0xd1   :  { %v245_v45 = vadd.f32 %v404_v40, %v216_v41  ;;  %v208_v46 = vadd.f32 %v207_v43, %v118_v42  ;;  %v250_v54 = vmax.f32 %v242_v44, 0.0 }
  0xd2   :  { %v444_v47 = vpop.f32.mrf.mxu0  ;;  %v456_v49 = vpop.f32.mrf.mxu1 }
  0xd3   :  { %v243_v50 = vadd.f32 %v404_v40, %v208_v46  ;;  %v253_v52 = vmax.f32 %v245_v45, 0.0  ;;  %v229_v59 = vadd.f32 %v456_v49, %v444_v47 }
  0xd4   :  { %v131_v51 = vpop.f32.mrf.mxu0  ;;  %v220_v53 = vpop.f32.mrf.mxu1 }
  0xd5   :  { %v251_v55 = vmax.f32 %v243_v50, 0.0  ;;  %v221_v56 = vadd.f32 %v220_v53, %v131_v51  ;;  %v259_v0 = vpack.c.bf16 %v253_v52, %v252_v58  ;;  %v248_v5 = vadd.f32 %v404_v40, %v229_v59 }
  0xd6   :  { %v445_v57 = vpop.f32.mrf.mxu0  ;;  %v457_v60 = vpop.f32.mrf.mxu1 }
  0xd7   :  { %v258_v61 = vpack.c.bf16 %v251_v55, %v250_v54  ;;  %v232_v62 = vadd.f32 %v457_v60, %v445_v57  ;;  %v246_v2 = vadd.f32 %v404_v40, %v221_v56  ;;  %v256_v10 = vmax.f32 %v248_v5, 0.0 }
  0xd8   :  { %v134_v63 = vpop.f32.mrf.mxu0  ;;  %v223_v1 = vpop.f32.mrf.mxu1 }
  0xd9   :  { %v249_v3 = vadd.f32 %v404_v40, %v232_v62  ;;  %v224_v4 = vadd.f32 %v223_v1, %v134_v63  ;;  %466 = vmatprep.mubr.msk.bf16.mxu0 %vm301_vm1, %v258_v61  ;;  %v254_v8 = vmax.f32 %v246_v2, 0.0 }
  0xda   :  { %467 = vmatmul.mubr.msk.bf16.vlgmr.msra.gmra.mxu0 %vm301_vm1, %v259_v0 }
  0xdb   :  { %v247_v6 = vadd.f32 %v404_v40, %v224_v4  ;;  %v257_v7 = vmax.f32 %v249_v3, 0.0 }
  0xdd   :  { %v255_v9 = vmax.f32 %v247_v6, 0.0  ;;  %v261_v12 = vpack.c.bf16 %v257_v7, %v256_v10 }
  0xdf   :  { %v260_v11 = vpack.c.bf16 %v255_v9, %v254_v8 }
  0xe1   :  { %470 = vmatprep.mubr.msk.bf16.mxu1 %vm301_vm1, %v260_v11 }
  0xe2   :  { %471 = vmatmul.mubr.msk.bf16.vlgmr.msra.gmra.mxu1 %vm301_vm1, %v261_v12 }
 0x19a   :  { %v468_v14 = vpop.f32.mrf.mxu0 }
 0x19b   :  { %v357_v15 = vadd.f32 %v468_v14, %v405_v13 }
 0x19c   :  { %v348_v16 = vpop.f32.mrf.mxu0 }
 0x19d   :  { %382 = vst.msk [vmem:[%s653_s6 + $0x10] sm:$0xff] %vm379_vm2, %v357_v15  ;;  %v349_v17 = vadd.f32 %v405_v13, %v348_v16 }
 0x19e   :  { %v469_v18 = vpop.f32.mrf.mxu0 }
 0x19f   :  { %380 = vst.msk [vmem:[%s653_s6] sm:$0xff] %vm379_vm2, %v349_v17  ;;  %v360_v19 = vadd.f32 %v469_v18, %v405_v13 }
 0x1a0   :  { %v351_v20 = vpop.f32.mrf.mxu0 }
 0x1a1   :  { %383 = vst.msk [vmem:[%s653_s6 + $0x18] sm:$0xff] %vm379_vm2, %v360_v19  ;;  %v352_v21 = vadd.f32 %v405_v13, %v351_v20 }
 0x1a2   :  { %v472_v22 = vpop.f32.mrf.mxu1 }
 0x1a3   :  { %381 = vst.msk [vmem:[%s653_s6 + $0x8] sm:$0xff] %vm379_vm2, %v352_v21  ;;  %v373_v23 = vadd.f32 %v472_v22, %v405_v13 }
 0x1a4   :  { %v364_v24 = vpop.f32.mrf.mxu1 }
 0x1a5   :  { %386 = vst.msk [vmem:[%s653_s6 + $0x30] sm:$0xff] %vm379_vm2, %v373_v23  ;;  %v365_v25 = vadd.f32 %v405_v13, %v364_v24 }
 0x1a6   :  { %v473_v26 = vpop.f32.mrf.mxu1 }
 0x1a7   :  { %384 = vst.msk [vmem:[%s653_s6 + $0x20] sm:$0xff] %vm379_vm2, %v365_v25  ;;  %v376_v27 = vadd.f32 %v473_v26, %v405_v13 }
 0x1a8   :  { %v367_v28 = vpop.f32.mrf.mxu1 }
 0x1a9   :  { %387 = vst.msk [vmem:[%s653_s6 + $0x38] sm:$0xff] %vm379_vm2, %v376_v27  ;;  %v368_v29 = vadd.f32 %v405_v13, %v367_v28 }
 0x1ab   :  { %385 = vst.msk [vmem:[%s653_s6 + $0x28] sm:$0xff] %vm379_vm2, %v368_v29 }

</bundles_post_ra>
